<compile_context>
chip_gen: v7x
topology: tpu7x:2x2x1
jax: 0.10.0
libtpu: 0.0.40
codegen_flags: <defaults>
</compile_context>

<pallas_src>
import functools

import jax
import jax.numpy as jnp
from jax.experimental import pallas as pl
from jax.experimental.pallas import tpu as pltpu


def _blu_kernel(x_ref, o_ref, *, pos_mult, neg_mult, clip_min, clip_max):
    x = x_ref[...]
    # Single transcendental per element (EUP): log(|x|) == log(x) for x > 0.
    log_abs = jnp.log(jnp.abs(x))
    # Select the multiplier, then one VPU multiply (instead of two muls + select).
    mult = jnp.where(x > 0, jnp.asarray(pos_mult, x.dtype), jnp.asarray(neg_mult, x.dtype))
    y = mult * log_abs
    o_ref[...] = jnp.clip(y, clip_min, clip_max).astype(o_ref.dtype)


def _blu_ref(x, pos_mult=2.0, neg_mult=-2.0, clip_min=-8.0, clip_max=8.0):
    """Pure-jnp reference / fallback (matches the PyTorch module incl. clip of +/-inf)."""
    log_abs = jnp.log(jnp.abs(x))
    mult = jnp.where(x > 0, jnp.asarray(pos_mult, x.dtype), jnp.asarray(neg_mult, x.dtype))
    return jnp.clip(mult * log_abs, clip_min, clip_max).astype(x.dtype)


def _round_up(v, m):
    return -(-v // m) * m


def blu(
    x,
    pos_multiplier=2.0,
    neg_multiplier=-2.0,
    clip_min=-8.0,
    clip_max=8.0,
    *,
    target_block_bytes=4 * 1024 * 1024,   # ~4 MiB/buffer; 4 buffers = 16 MiB VMEM
    min_pallas_elements=1 << 16,          # below this, fused XLA elementwise is faster
):
    orig_shape = x.shape
    dtype = x.dtype
    itemsize = jnp.dtype(dtype).itemsize
    n = x.size

    LANE = 128
    n_main = (n // LANE) * LANE  # 128-aligned prefix handled by Pallas
    tail = n - n_main

    # Tiny inputs: pallas_call launch + grid overhead dominates; let XLA fuse it.
    if n == 0 or n < min_pallas_elements or n_main == 0:
        return _blu_ref(x, pos_multiplier, neg_multiplier, clip_min, clip_max)

    x_flat = jnp.ravel(x)                     # reshape only; no HBM copy
    x_main = x_flat[:n_main] if tail else x_flat

    # Widest lane-dense column count dividing the prefix (128 always works).
    cols = LANE
    for c in (4096, 2048, 1024, 512, 256):
        if n_main % c == 0:
            cols = c
            break
    rows = n_main // cols
    x2d = x_main.reshape(rows, cols)

    # Block rows: ~target_block_bytes per buffer, multiple of 32 sublanes
    # (covers f32 / bf16 / int8 packing); fall back to full extent for small inputs.
    granule = 32
    tile_rows = max(granule, (target_block_bytes // (cols * itemsize)) // granule * granule)
    tile_rows = min(tile_rows, rows)
    grid_rows = pl.cdiv(rows, tile_rows)

    # v7x has 2 TensorCores that share "parallel" grid steps: when there is enough
    # work, make sure there are at least two (preferably an even number of) steps
    # so neither core idles. On v5e/v6e (1 TC) this is measured-neutral.
    if rows >= 2 * granule and (grid_rows < 2 or grid_rows % 2 == 1):
        target_grid = 2 if grid_rows < 2 else grid_rows + 1
        tile_rows = min(rows, _round_up(pl.cdiv(rows, target_grid), granule))
        grid_rows = pl.cdiv(rows, tile_rows)   # ragged last block is masked by Pallas

    kernel = functools.partial(
        _blu_kernel,
        pos_mult=pos_multiplier,
        neg_mult=neg_multiplier,
        clip_min=clip_min,
        clip_max=clip_max,
    )

    out2d = pl.pallas_call(
        kernel,
        out_shape=jax.ShapeDtypeStruct((rows, cols), dtype),
        grid=(grid_rows,),
        in_specs=[pl.BlockSpec((tile_rows, cols), lambda i: (i, 0))],
        out_specs=pl.BlockSpec((tile_rows, cols), lambda i: (i, 0)),
        compiler_params=pltpu.CompilerParams(
            dimension_semantics=("parallel",),       # shard grid steps across v7x's 2 TCs
            vmem_limit_bytes=32 * 1024 * 1024,       # 4 x ~4 MiB buffers fits everywhere
            allow_input_fusion=[True],               # let XLA fold a producer into the input
        ),
        cost_estimate=pl.CostEstimate(
            flops=5 * n_main,
            transcendentals=n_main,
            bytes_accessed=2 * n_main * itemsize,    # one read + one write per element
        ),
    )(x2d)

    out_flat = out2d.reshape(-1)
    if tail:
        # <=127-element tail: fused XLA elementwise, no pad/slice HBM passes.
        tail_out = _blu_ref(x_flat[n_main:], pos_multiplier, neg_multiplier, clip_min, clip_max)
        out_flat = jnp.concatenate([out_flat, tail_out])
    return out_flat.reshape(orig_shape)


if __name__ == "__main__":
    key = jax.random.PRNGKey(0)
    k1, k2 = jax.random.split(key)

    # Small NCHW input consistent with a conv-style activation module.
    # (force the Pallas path even though it is below the tiny-input cutoff)
    x1 = jax.random.normal(k1, (2, 4, 16, 16), dtype=jnp.float32)
    y1 = jax.block_until_ready(blu(x1, min_pallas_elements=0))
    ref1 = _blu_ref(x1)
    assert y1.shape == x1.shape and y1.dtype == x1.dtype
    assert jnp.allclose(y1, ref1, atol=1e-5, rtol=1e-5)

    # Non-128-divisible element count: exercises the aligned-prefix Pallas + jnp-tail path.
    x2 = jax.random.normal(k2, (3, 5, 17), dtype=jnp.float32)
    y2 = jax.block_until_ready(blu(x2, min_pallas_elements=0))
    ref2 = _blu_ref(x2)
    assert y2.shape == x2.shape and y2.dtype == x2.dtype
    assert jnp.allclose(y2, ref2, atol=1e-5, rtol=1e-5)

    print("KERNEL_OK")
</pallas_src>

<mosaic_0001>
module attributes {stable_mosaic.version = 11 : i64} {
  func.func @_blu_kernel(%arg0: i32, %arg1: memref<1x2048xf32, #tpu.memory_space<vmem>>, %arg2: memref<1x2048xf32, #tpu.memory_space<vmem>>) attributes {dimension_semantics = [#tpu.dimension_semantics<parallel>], iteration_bounds = array<i64: 1>, scalar_prefetch = 0 : i64, scratch_operands = 0 : i64, tpu.core_type = #tpu.core_type<tc>, window_params = [{transform_indices = @transform_0, window_bounds = array<i64: 1, 2048>}, {transform_indices = @transform_1, window_bounds = array<i64: 1, 2048>}]} {
    %c0 = arith.constant 0 : index
    %c0_0 = arith.constant 0 : index
    %0 = vector.load %arg1[%c0, %c0_0] : memref<1x2048xf32, #tpu.memory_space<vmem>>, vector<1x2048xf32>
    %1 = math.absf %0 : vector<1x2048xf32>
    %2 = math.log %1 : vector<1x2048xf32>
    %cst = arith.constant 0.000000e+00 : f32
    %3 = vector.broadcast %cst : f32 to vector<1x2048xf32>
    %4 = arith.cmpf ogt, %0, %3 : vector<1x2048xf32>
    %cst_1 = arith.constant 2.000000e+00 : f32
    %cst_2 = arith.constant -2.000000e+00 : f32
    %5 = vector.broadcast %cst_1 : f32 to vector<1x2048xf32>
    %6 = vector.broadcast %cst_2 : f32 to vector<1x2048xf32>
    %7 = arith.select %4, %5, %6 : vector<1x2048xi1>, vector<1x2048xf32>
    %8 = arith.mulf %7, %2 : vector<1x2048xf32>
    %cst_3 = arith.constant -8.000000e+00 : f32
    %cst_4 = arith.constant 8.000000e+00 : f32
    %9 = vector.broadcast %cst_3 : f32 to vector<1x2048xf32>
    %10 = arith.maximumf %9, %8 : vector<1x2048xf32>
    %11 = vector.broadcast %cst_4 : f32 to vector<1x2048xf32>
    %12 = arith.minimumf %11, %10 : vector<1x2048xf32>
    %c0_5 = arith.constant 0 : index
    %c0_6 = arith.constant 0 : index
    %13 = vector.load %arg2[%c0_5, %c0_6] : memref<1x2048xf32, #tpu.memory_space<vmem>>, vector<1x2048xf32>
    tpu.vector_store %arg2[%c0_5, %c0_6], %12 {strides = array<i32>} : memref<1x2048xf32, #tpu.memory_space<vmem>>, vector<1x2048xf32>,
    return
  }
  func.func @transform_0(%arg0: i32) -> (i32, i32) {
    %c0_i32 = arith.constant 0 : i32
    %c0_i32_0 = arith.constant 0 : i32
    return %arg0, %c0_i32 : i32, i32
  }
  func.func @transform_1(%arg0: i32) -> (i32, i32) {
    %c0_i32 = arith.constant 0 : i32
    %c0_i32_0 = arith.constant 0 : i32
    return %arg0, %c0_i32 : i32, i32
  }
}

</mosaic_0001>

<bundles_post_ra>
// kernel: tpu_custom_call.1
= control target key start
LH: loop header
LB: loop body
LE: loop exit
PB: predicated region body
PF: predicated region fallthrough
CT: control target
= control target key end

     0   :  { %6 = vsyncpa [#allocation3], 0  ;;  %s150_s0 = inlined_call_operand.hbm [shape: f32[1,2048], index: 0, kind: input, shape index: {}]   ;;  %s151_s1 = inlined_call_operand.hbm [shape: f32[1,2048], index: 1, kind: output, shape index: {}]  }
   0x1   :  { %7 = vsyncpa [#allocation4], 0  ;;  %s113_s6 = smov [#allocation2]   ;;  %s65_s10 = scalar_lea.hbm %s150_s0, 256 }
   0x2   :  { %s14_s7 = sshll.u32 %s113_s6, 4  ;;  %p66_p0 = scmp.ne.s32.totalorder %s150_s0, %s65_s10  ;;  %s15_s7 = int_to_ptr.vmem [resolvable:$true] %s14_s7 }
   0x3   :  { %p69_p1 = scmp.lt.u32.totalorder %s65_s10, %s150_s0 }
   0x5   :  { %p71_p2 = pnand %p69_p1, %p66_p0 }
   0x7   :  { %74 = shalt.err (!%p71_p2)
}
   0x8   :  { %s75_s15 = scalar_lea.vmem %s15_s7, 256  ;;  %p80_p4 = scmp.lt.s32.totalorder %s15_s7, %s15_s7 }
   0x9   :  { %p76_p3 = scmp.ne.s32.totalorder %s15_s7, %s75_s15  ;;  %p81_p5 = scmp.lt.s32.totalorder %s75_s15, %s75_s15 }
   0xb   :  { %p82_p6 = por %p81_p5, %p80_p4 }
   0xd   :  { %p83_p7 = pnand %p82_p6, %p76_p3 }
   0xf   :  { %86 = shalt.err (!%p83_p7)
}
  0x10   :  { %17 = dma.hbm_to_vmem [thread:$0]  %s150_s0, 256, %s15_s7, [#allocation3]  }
  0x11   :  { %109 = dma.done.wait [#allocation3], 256  }
  0x12   :  { %110 = vsyncadd [#allocation3], 4294967040  ;;  %v21_v0 = vld [vmem:[#allocation2] sm:$0xff]  ;;  %v22_v1 = vld [vmem:[#allocation2 + $0x8] sm:$0xff]  ;;  %v114_v5 = vmov -2.0   ;;  %s115_s18 = smov [#allocation5]  }
  0x13   :  { %v23_v2 = vand.u32 2147483647, %v21_v0  ;;  %v24_v3 = vand.u32 2147483647, %v22_v1  ;;  %vm29_vm0 = vcmp.gt.f32.partialorder %v21_v0, 0.0  ;;  %vm30_vm1 = vcmp.gt.f32.partialorder %v22_v1, 0.0 }
  0x14   :  { %v31_v6 = vsel %vm29_vm0, 2.0, %v114_v5  ;;  %v32_v9 = vsel %vm30_vm1, 2.0, %v114_v5  ;;  %s47_s0 = sshll.u32 %s115_s18, 4  ;;  %s48_s0 = int_to_ptr.vmem [resolvable:$true] %s47_s0 }
  0x15   :  { %61 = vlog2.f32 %v23_v2  ;;  %s87_s19 = scalar_lea.vmem %s48_s0, 256  ;;  %p92_p9 = scmp.lt.s32.totalorder %s48_s0, %s48_s0 }
  0x16   :  { %63 = vlog2.f32 %v24_v3  ;;  %p88_p8 = scmp.ne.s32.totalorder %s48_s0, %s87_s19  ;;  %p93_p10 = scmp.lt.s32.totalorder %s87_s19, %s87_s19 }
  0x18   :  { %p94_p11 = por %p93_p10, %p92_p9 }
  0x1a   :  { %p95_p12 = pnand %p94_p11, %p88_p8 }
  0x1f   :  { %v62_v4 = vpop.eup %61 }
  0x20   :  { %v64_v7 = vpop.eup %63  ;;  %v26_v8 = vmul.f32 0.6931472, %v62_v4 }
  0x21   :  { %v28_v10 = vmul.f32 0.6931472, %v64_v7 }
  0x22   :  { %v33_v11 = vmul.f32 %v31_v6, %v26_v8 }
  0x23   :  { %v34_v12 = vmul.f32 %v32_v9, %v28_v10 }
  0x24   :  { %v56_v13 = vclamps-f32 %v33_v11, 8.0 }
  0x25   :  { %v57_v14 = vclamps-f32 %v34_v12, 8.0 }
  0x26   :  { %39 = vst [vmem:[#allocation5] sm:$0xff] %v56_v13 }
  0x27   :  { %40 = vst [vmem:[#allocation5 + $0x8] sm:$0xff] %v57_v14 }
  0x28   :  { %98 = shalt.err (!%p95_p12)
}
  0x29   :  { %s99_s22 = scalar_lea.hbm %s151_s1, 256 }
  0x2a   :  { %p100_p13 = scmp.ne.s32.totalorder %s151_s1, %s99_s22  ;;  %p103_p0 = scmp.lt.u32.totalorder %s99_s22, %s151_s1 }
  0x2c   :  { %p105_p1 = pnand %p103_p0, %p100_p13 }
  0x2e   :  { %108 = shalt.err (!%p105_p1)
}
  0x2f   :  { %50 = dma.vmem_to_hbm [thread:$0]  %s48_s0, 256, %s151_s1, [#allocation4]  }
  0x30   :  { %111 = dma.done.wait [#allocation4], 256  }
  0x31   :  { %112 = vsyncadd [#allocation4], 4294967040 }
  0x32   :  { %54 = vsyncpa [#allocation3], 1 }
  0x33   :  { %55 = vsyncpa [#allocation4], 1 }

</bundles_post_ra>
